<compile_context>
chip_gen: v5e
topology: v5e:2x2
jax: 0.10.0
libtpu: 0.0.40
codegen_flags: <defaults>
</compile_context>

<pallas_src>
import functools

import jax
import jax.numpy as jnp
from jax.experimental import pallas as pl
from jax.experimental.pallas import tpu as pltpu

_LANES = 128
_SMOOTH = 1e-12


def _dice_kernel(logits_ref, labels_ref, score_ref,
                 acc_inter, acc_s1, acc_s2, *, prob_mode: bool):
    fb = pl.program_id(1)

    @pl.when(fb == 0)
    def _init():
        acc_inter[...] = jnp.zeros_like(acc_inter)
        acc_s1[...] = jnp.zeros_like(acc_s1)
        acc_s2[...] = jnp.zeros_like(acc_s2)

    x = logits_ref[...]
    if prob_mode:
        m1 = x > jnp.asarray(0.5, dtype=x.dtype)
    else:
        # sigmoid(x) > 0.5  <=>  x > 0  (exact; avoids the EUP exp/recip chain)
        m1 = x > jnp.asarray(0.0, dtype=x.dtype)
    m2 = labels_ref[...].astype(jnp.float32)

    # Lane-wide running partials: pure VPU select/add in the steady state; the
    # cross-lane (XLU) reduce happens only once, in the finalize step.
    acc_inter[...] += jnp.where(m1, m2, 0.0)
    acc_s1[...] += m1.astype(jnp.float32)
    acc_s2[...] += m2

    @pl.when(fb == pl.num_programs(1) - 1)
    def _finalize():
        inter = jnp.sum(acc_inter[...], axis=-1, keepdims=True)   # (TN, 1)
        s1 = jnp.sum(acc_s1[...], axis=-1, keepdims=True)
        s2 = jnp.sum(acc_s2[...], axis=-1, keepdims=True)
        score_ref[...] = 2.0 * inter / (s1 + s2 + _SMOOTH)


def dice_accuracy(logits, labels, prob_mode: bool = False, f_tile: int = 2048):
    """Pallas implementation of DiceAccuracy_v1.forward."""
    N = logits.shape[0]
    logits2d = logits.reshape(N, -1)
    labels2d = labels.reshape(N, -1)
    F = logits2d.shape[1]

    # F tile: multiple of 128 lanes, no bigger than (lane-padded) F.  Modest
    # default so 2 inputs x 2 pipeline buffers x TN x f_tile stays far under
    # the scoped-VMEM budget even on v7x (64 MiB physical / 32 MiB scoped).
    f_pad_lane = pl.cdiv(F, _LANES) * _LANES
    f_tile = min(f_tile, f_pad_lane)
    f_tile = max(_LANES, (f_tile // _LANES) * _LANES)

    # N tile: one block if N is small (block dim == full dim is always legal),
    # otherwise sublane-aligned 8-row blocks so the leading grid axis can be
    # sharded across TensorCores.
    if N <= 8:
        tn = N
        n_pad = N
    else:
        tn = 8
        n_pad = pl.cdiv(N, tn) * tn

    f_pad = pl.cdiv(F, f_tile) * f_tile

    # Zero padding is inert: padded logits give m1 == 0 (x>0 and x>0.5 are both
    # False at 0), padded labels give m2 == 0, so intersection/s1/s2 are
    # unchanged; padded rows score 0 and are excluded from the mean below.
    if (f_pad != F) or (n_pad != N):
        logits2d = jnp.pad(logits2d, ((0, n_pad - N), (0, f_pad - F)))
        labels2d = jnp.pad(labels2d, ((0, n_pad - N), (0, f_pad - F)))

    n_blocks = n_pad // tn
    f_blocks = f_pad // f_tile

    kernel = functools.partial(_dice_kernel, prob_mode=prob_mode)

    scores = pl.pallas_call(
        kernel,
        out_shape=jax.ShapeDtypeStruct((n_pad, 1), jnp.float32),
        grid_spec=pltpu.PrefetchScalarGridSpec(
            num_scalar_prefetch=0,
            grid=(n_blocks, f_blocks),
            in_specs=[
                pl.BlockSpec((tn, f_tile), lambda nb, fb: (nb, fb)),
                pl.BlockSpec((tn, f_tile), lambda nb, fb: (nb, fb)),
            ],
            out_specs=pl.BlockSpec((tn, 1), lambda nb, fb: (nb, 0)),
            scratch_shapes=[
                pltpu.VMEM((tn, f_tile), jnp.float32),   # intersection partials
                pltpu.VMEM((tn, f_tile), jnp.float32),   # |m1| partials
                pltpu.VMEM((tn, f_tile), jnp.float32),   # |m2| partials
            ],
        ),
        compiler_params=pltpu.CompilerParams(
            dimension_semantics=("parallel", "arbitrary"),
        ),
    )(logits2d, labels2d)

    # Tiny final mean over the real (un-padded) per-sample scores.
    return jnp.sum(scores[:N, 0]) / N


if __name__ == "__main__":
    key = jax.random.PRNGKey(0)
    k1, k2 = jax.random.split(key)

    # Small segmentation-metric shapes: N=2, C=4, H=W=16 (F = 1024).
    logits = jax.random.normal(k1, (2, 4, 16, 16), dtype=jnp.float32)
    labels = (jax.random.uniform(k2, (2, 4, 16, 16)) > 0.5).astype(jnp.float32)

    # Use a small F tile so the multi-block accumulation path is exercised.
    score = dice_accuracy(logits, labels, prob_mode=False, f_tile=256)
    score = jax.block_until_ready(score)

    # Pure-JAX reference (same math as the PyTorch module).
    N = logits.shape[0]
    m1 = (jax.nn.sigmoid(logits.reshape(N, -1)) > 0.5).astype(jnp.float32)
    m2 = labels.reshape(N, -1)
    inter = jnp.sum(m1 * m2, axis=1)
    ref = jnp.sum(2.0 * inter / (m1.sum(1) + m2.sum(1) + 1e-12)) / N

    assert jnp.allclose(score, ref, rtol=1e-6, atol=1e-6), (score, ref)
    print("KERNEL_OK")
</pallas_src>

<mosaic_0001>
module attributes {stable_mosaic.version = 11 : i64} {
  func.func @_dice_kernel(%arg0: i32, %arg1: i32, %arg2: memref<2x256xf32, #tpu.memory_space<vmem>>, %arg3: memref<2x256xf32, #tpu.memory_space<vmem>>, %arg4: memref<2x1xf32, #tpu.memory_space<vmem>>, %arg5: memref<2x256xf32, #tpu.memory_space<vmem>>, %arg6: memref<2x256xf32, #tpu.memory_space<vmem>>, %arg7: memref<2x256xf32, #tpu.memory_space<vmem>>) attributes {dimension_semantics = [#tpu.dimension_semantics<parallel>, #tpu.dimension_semantics<arbitrary>], iteration_bounds = array<i64: 1, 4>, scalar_prefetch = 0 : i64, scratch_operands = 3 : i64, tpu.core_type = #tpu.core_type<tc>, window_params = [{transform_indices = @transform_0, window_bounds = array<i64: 2, 256>}, {transform_indices = @transform_1, window_bounds = array<i64: 2, 256>}, {transform_indices = @transform_2, window_bounds = array<i64: 2, 1>}]} {
    %c0_i32 = arith.constant 0 : i32
    %0 = arith.cmpi eq, %arg1, %c0_i32 : i32
    %1 = arith.extui %0 : i1 to i32
    %c0_i32_0 = arith.constant 0 : i32
    %2 = arith.cmpi ne, %1, %c0_i32_0 : i32
    scf.if %2 {
      %cst_18 = arith.constant 0.000000e+00 : f32
      %23 = vector.broadcast %cst_18 : f32 to vector<2x256xf32>
      %c0_19 = arith.constant 0 : index
      %c0_20 = arith.constant 0 : index
      %24 = vector.load %arg5[%c0_19, %c0_20] : memref<2x256xf32, #tpu.memory_space<vmem>>, vector<2x256xf32>
      tpu.vector_store %arg5[%c0_19, %c0_20], %23 {strides = array<i32>} : memref<2x256xf32, #tpu.memory_space<vmem>>, vector<2x256xf32>,
      %cst_21 = arith.constant 0.000000e+00 : f32
      %25 = vector.broadcast %cst_21 : f32 to vector<2x256xf32>
      %c0_22 = arith.constant 0 : index
      %c0_23 = arith.constant 0 : index
      %26 = vector.load %arg6[%c0_22, %c0_23] : memref<2x256xf32, #tpu.memory_space<vmem>>, vector<2x256xf32>
      tpu.vector_store %arg6[%c0_22, %c0_23], %25 {strides = array<i32>} : memref<2x256xf32, #tpu.memory_space<vmem>>, vector<2x256xf32>,
      %cst_24 = arith.constant 0.000000e+00 : f32
      %27 = vector.broadcast %cst_24 : f32 to vector<2x256xf32>
      %c0_25 = arith.constant 0 : index
      %c0_26 = arith.constant 0 : index
      %28 = vector.load %arg7[%c0_25, %c0_26] : memref<2x256xf32, #tpu.memory_space<vmem>>, vector<2x256xf32>
      tpu.vector_store %arg7[%c0_25, %c0_26], %27 {strides = array<i32>} : memref<2x256xf32, #tpu.memory_space<vmem>>, vector<2x256xf32>,
    } else {
    }
    %c0 = arith.constant 0 : index
    %c0_1 = arith.constant 0 : index
    %3 = vector.load %arg2[%c0, %c0_1] : memref<2x256xf32, #tpu.memory_space<vmem>>, vector<2x256xf32>
    %cst = arith.constant 0.000000e+00 : f32
    %4 = vector.broadcast %cst : f32 to vector<2x256xf32>
    %5 = arith.cmpf ogt, %3, %4 : vector<2x256xf32>
    %c0_2 = arith.constant 0 : index
    %c0_3 = arith.constant 0 : index
    %6 = vector.load %arg3[%c0_2, %c0_3] : memref<2x256xf32, #tpu.memory_space<vmem>>, vector<2x256xf32>
    %c0_4 = arith.constant 0 : index
    %c0_5 = arith.constant 0 : index
    %7 = vector.load %arg5[%c0_4, %c0_5] : memref<2x256xf32, #tpu.memory_space<vmem>>, vector<2x256xf32>
    %cst_6 = arith.constant 0.000000e+00 : f32
    %8 = vector.broadcast %cst_6 : f32 to vector<2x256xf32>
    %9 = arith.select %5, %6, %8 : vector<2x256xi1>, vector<2x256xf32>
    %10 = arith.addf %7, %9 : vector<2x256xf32>
    %c0_7 = arith.constant 0 : index
    %c0_8 = arith.constant 0 : index
    %11 = vector.load %arg5[%c0_7, %c0_8] : memref<2x256xf32, #tpu.memory_space<vmem>>, vector<2x256xf32>
    tpu.vector_store %arg5[%c0_7, %c0_8], %10 {strides = array<i32>} : memref<2x256xf32, #tpu.memory_space<vmem>>, vector<2x256xf32>,
    %c0_9 = arith.constant 0 : index
    %c0_10 = arith.constant 0 : index
    %12 = vector.load %arg6[%c0_9, %c0_10] : memref<2x256xf32, #tpu.memory_space<vmem>>, vector<2x256xf32>
    %13 = arith.extui %5 : vector<2x256xi1> to vector<2x256xi32>
    %14 = arith.sitofp %13 : vector<2x256xi32> to vector<2x256xf32>
    %15 = arith.addf %12, %14 : vector<2x256xf32>
    %c0_11 = arith.constant 0 : index
    %c0_12 = arith.constant 0 : index
    %16 = vector.load %arg6[%c0_11, %c0_12] : memref<2x256xf32, #tpu.memory_space<vmem>>, vector<2x256xf32>
    tpu.vector_store %arg6[%c0_11, %c0_12], %15 {strides = array<i32>} : memref<2x256xf32, #tpu.memory_space<vmem>>, vector<2x256xf32>,
    %c0_13 = arith.constant 0 : index
    %c0_14 = arith.constant 0 : index
    %17 = vector.load %arg7[%c0_13, %c0_14] : memref<2x256xf32, #tpu.memory_space<vmem>>, vector<2x256xf32>
    %18 = arith.addf %17, %6 : vector<2x256xf32>
    %c0_15 = arith.constant 0 : index
    %c0_16 = arith.constant 0 : index
    %19 = vector.load %arg7[%c0_15, %c0_16] : memref<2x256xf32, #tpu.memory_space<vmem>>, vector<2x256xf32>
    tpu.vector_store %arg7[%c0_15, %c0_16], %18 {strides = array<i32>} : memref<2x256xf32, #tpu.memory_space<vmem>>, vector<2x256xf32>,
    %c3_i32 = arith.constant 3 : i32
    %20 = arith.cmpi eq, %arg1, %c3_i32 : i32
    %21 = arith.extui %20 : i1 to i32
    %c0_i32_17 = arith.constant 0 : i32
    %22 = arith.cmpi ne, %21, %c0_i32_17 : i32
    scf.if %22 {
      %c0_18 = arith.constant 0 : index
      %c0_19 = arith.constant 0 : index
      %23 = vector.load %arg5[%c0_18, %c0_19] : memref<2x256xf32, #tpu.memory_space<vmem>>, vector<2x256xf32>
      %cst_20 = arith.constant dense<0.000000e+00> : vector<2xf32>
      %24 = vector.multi_reduction <add>, %23, %cst_20 [1] : vector<2x256xf32> to vector<2xf32>
      %25 = vector.shape_cast %24 : vector<2xf32> to vector<2x1xf32>
      %c0_21 = arith.constant 0 : index
      %c0_22 = arith.constant 0 : index
      %26 = vector.load %arg6[%c0_21, %c0_22] : memref<2x256xf32, #tpu.memory_space<vmem>>, vector<2x256xf32>
      %cst_23 = arith.constant dense<0.000000e+00> : vector<2xf32>
      %27 = vector.multi_reduction <add>, %26, %cst_23 [1] : vector<2x256xf32> to vector<2xf32>
      %28 = vector.shape_cast %27 : vector<2xf32> to vector<2x1xf32>
      %c0_24 = arith.constant 0 : index
      %c0_25 = arith.constant 0 : index
      %29 = vector.load %arg7[%c0_24, %c0_25] : memref<2x256xf32, #tpu.memory_space<vmem>>, vector<2x256xf32>
      %cst_26 = arith.constant dense<0.000000e+00> : vector<2xf32>
      %30 = vector.multi_reduction <add>, %29, %cst_26 [1] : vector<2x256xf32> to vector<2xf32>
      %31 = vector.shape_cast %30 : vector<2xf32> to vector<2x1xf32>
      %cst_27 = arith.constant 2.000000e+00 : f32
      %32 = vector.broadcast %cst_27 : f32 to vector<2x1xf32>
      %33 = arith.mulf %32, %25 : vector<2x1xf32>
      %34 = arith.addf %28, %31 : vector<2x1xf32>
      %cst_28 = arith.constant 9.99999996E-13 : f32
      %35 = vector.broadcast %cst_28 : f32 to vector<2x1xf32>
      %36 = arith.addf %34, %35 : vector<2x1xf32>
      %37 = arith.divf %33, %36 : vector<2x1xf32>
      %c0_29 = arith.constant 0 : index
      %c0_30 = arith.constant 0 : index
      %38 = vector.load %arg4[%c0_29, %c0_30] : memref<2x1xf32, #tpu.memory_space<vmem>>, vector<2x1xf32>
      tpu.vector_store %arg4[%c0_29, %c0_30], %37 {strides = array<i32>} : memref<2x1xf32, #tpu.memory_space<vmem>>, vector<2x1xf32>,
    } else {
    }
    return
  }
  func.func @transform_0(%arg0: i32, %arg1: i32) -> (i32, i32) {
    %c0_i32 = arith.constant 0 : i32
    return %arg0, %arg1 : i32, i32
  }
  func.func @transform_1(%arg0: i32, %arg1: i32) -> (i32, i32) {
    %c0_i32 = arith.constant 0 : i32
    return %arg0, %arg1 : i32, i32
  }
  func.func @transform_2(%arg0: i32, %arg1: i32) -> (i32, i32) {
    %c0_i32 = arith.constant 0 : i32
    %c0_i32_0 = arith.constant 0 : i32
    return %arg0, %c0_i32 : i32, i32
  }
}

</mosaic_0001>

<bundles_post_ra>
// kernel: tpu_custom_call.1
= control target key start
LH: loop header
LB: loop body
LE: loop exit
PB: predicated region body
PF: predicated region fallthrough
CT: control target
= control target key end

     0   :  { %7 = vsyncpa [#allocation6], 0  ;;  %s724_s0 = inlined_call_operand.hbm [shape: f32[2,1024], index: 0, kind: input, shape index: {}]   ;;  %s725_s1 = inlined_call_operand.hbm [shape: f32[2,1024], index: 1, kind: input, shape index: {}]   ;;  %s726_s2 = inlined_call_operand.vmem [shape: f32[2,1], index: 2, kind: output, shape index: {}]  }
   0x1   :  { %9 = vsyncpa [#allocation6 + $0x1], 0 }
   0x2   :  { %10 = vsyncpa [#allocation8], 0 }
   0x3   :  { %12 = vsyncpa [#allocation8 + $0x1], 0  ;;  %s623_s9 = smov 0   ;;  %s625_s10 = smov 0  }
   0x4   :  { %s627_s11 = smov 0   ;;  %s629_s12 = smov 0  }
   0x5   :  { %s631_s13 = smov 0   ;;  %s633_s14 = smov 0  }
   0x6 LB: > { %s406_s15 = sadd.s32 4294967295, %s604_s14   ;;  %s27_s16 = sadd.s32 1, %s600_s13  ;;  %s604_s14 = sphi %s633_s14, %s18_s14   ;;  %s600_s13 = sphi %s631_s13, %s733_s13   ;;  %s596_s12 = sphi %s629_s12, %s732_s12   ;;  %s592_s11 = sphi %s627_s11, %s731_s11   ;;  %s588_s10 = sphi %s625_s10, %s730_s10   ;;  %s584_s9 = sphi %s623_s9, %s729_s9  }
   0x7   : > { %p28_p0 = scmp.ge.s32.totalorder %s27_s16, 4  ;;  %s39_s17 = sadd.s32 1, %s592_s11 }
   0x8   : > { %p46_p1 = scmp.ne.s32.totalorder %s592_s11, %s588_s10  ;;  %p47_p2 = scmp.eq.s32.totalorder %s604_s14, 0 }
   0x9   : > { %s735_s16 = smov (%p28_p0, %s27_s16), 0  ;;  %p52_p4 = scmp.ne.s32.totalorder %s588_s10, %s584_s9 }
   0xa   : > { %p659_p3 = por %p47_p2, %p46_p1  ;;  %s35_s19 = ssub.s32 %s600_s13, %s735_s16 }
   0xb   : > { %p53_p5 = scmp.eq.s32.totalorder %s406_s15, 0  ;;  %p37_p6 = scmp.eq.s32.totalorder %s35_s19, 0 }
   0xc   : > { %p437_p8 = scmp.lt.s32.totalorder %s604_s14, 4  ;;  %s130_s22 = sand.u32 1, %s592_s11  }
   0xd   : > { %p666_p7 = por %p53_p5, %p52_p4  ;;  %s424_s23 = sshll.u32 %s600_s13, 2 }
   0xe   : > { %s672_s21 = scalar_select %p37_p6, %s592_s11, %s39_s17  }
   0xf   : > { %s409_s24 = sshll.u32 %s130_s22, 2  ;;  %s141_s27 = scalar_lea.hbm %s724_s0, %s424_s23 }
  0x10   : > { %s143_s28 = sshll.u32 %s141_s27, 4  ;;  %s134_s29 = scalar_lea.vmem [#allocation5], %s409_s24  ;;  %s144_s28 = int_to_ptr.hbm [resolvable:$true] %s143_s28 }
  0x11   : > { %s145_s30 = sshll.u32 %s134_s29, 4  ;;  %p431_p9 = pnand %p437_p8, %p659_p3  ;;  %s146_s30 = int_to_ptr.vmem [resolvable:$true] %s145_s30 }
  0x12   : > { %p415_p10 = scmp.ge.s32.totalorder %s604_s14, 1  ;;  %p172_p11 = scmp.lt.s32.totalorder %s604_s14, 5 }
  0x13   : > { %s131_s3 = scalar_lea.sflag [#allocation6], %s130_s22  ;;  %s163_s6 = scalar_lea.hbm %s725_s1, %s424_s23 }
  0x14   : > { %433 = dma.hbm_to_vmem [thread:$0]  (!%p431_p9), %s144_s28, 64, %s146_s30, %s131_s3  }
  0x15   : > { %p173_p12 = pnand %p415_p10, %p172_p11  ;;  %s165_s7 = sshll.u32 %s163_s6, 4  ;;  %s166_s7 = int_to_ptr.hbm [resolvable:$true] %s165_s7 }
  0x16   : > { %s156_s8 = scalar_lea.vmem [#allocation7], %s409_s24  ;;  %s153_s15 = scalar_lea.sflag [#allocation8], %s130_s22 }
  0x17   : > { %s167_s9 = sshll.u32 %s156_s8, 4  ;;  %176 = sbr.rel (%p173_p12) target bundleno = 224 (0xe0), region = 28  ;;  %s168_s9 = int_to_ptr.vmem [resolvable:$true] %s167_s9 }
  0x18   : > { %436 = dma.hbm_to_vmem [thread:$0]  (!%p431_p9), %s166_s7, 64, %s168_s9, %s153_s15  }
  0x19   : > { %s178_s17 = sand.u32 (!%p173_p12), 1, %s588_s10  }
  0x1a   : > { %s416_s18 = sshll.u32 (!%p173_p12), %s178_s17, 2  ;;  %s179_s19 = scalar_lea.sflag (!%p173_p12), [#allocation6], %s178_s17 }
  0x1b   : > { %s182_s25 = scalar_lea.vmem (!%p173_p12), [#allocation5], %s416_s18 }
  0x1c   : > { %575 = dma.done.wait (%p666_p7), %s179_s19, 64  }
  0x1d   : > { %577 = vsyncadd (%p666_p7), %s179_s19, 4294967232  ;;  %s189_s23 = scalar_lea.sflag [#allocation8], %s178_s17  ;;  %s192_s24 = scalar_lea.vmem [#allocation7], %s416_s18 }
  0x1e   : > { %579 = dma.done.wait (%p666_p7), %s189_s23, 64  }
  0x1f   : > { %581 = vsyncadd (%p666_p7), %s189_s23, 4294967232  ;;  %p418_p13 = scmp.ne.s32.totalorder %s596_s12, 0 }
  0x21   : > { %227 = sbr.rel (%p418_p13) target bundleno = 42 (0x2a), region = 40 }
  0x26   : > { %v606_v0 = vmov 0.0  }
  0x27   : > { %228 = vst [vmem:[#allocation2] sm:$0xf] %v606_v0 }
  0x28   : > { %229 = vst [vmem:[#allocation3] sm:$0xf] %v606_v0 }
  0x29   : > { %230 = vst [vmem:[#allocation4] sm:$0xf] %v606_v0 }
  0x2a PF: > { %v231_v1 = vld [vmem:[%s182_s25] sm:$0xf]  ;;  %v233_v2 = vld [vmem:[%s192_s24] sm:$0xf]  ;;  %v607_v7 = vmov 0.0   ;;  %p420_p0 = scmp.ne.s32.totalorder %s596_s12, 3 }
  0x2b   : > { %vm232_vm0 = vcmp.gt.f32.partialorder %v231_v1, 0.0 }
  0x2c   : > { %v235_v6 = vsel %vm232_vm0, %v233_v2, 0.0  ;;  %v419_v8 = vsel %vm232_vm0, 1.0, %v607_v7 }
  0x2e   : > { %v234_v3 = vld [vmem:[#allocation2] sm:$0xf] }
  0x2f   : > { %v238_v4 = vld [vmem:[#allocation3] sm:$0xf]  ;;  %v236_v10 = vadd.f32 %v235_v6, %v234_v3  ;;  %249 = sbr.rel (%p420_p0) target bundleno = 224 (0xe0), region = 44 }
  0x30   : > { %v243_v5 = vld [vmem:[#allocation4] sm:$0xf]  ;;  %v241_v11 = vadd.f32 %v419_v8, %v238_v4 }
  0x31   : > { %v244_v9 = vadd.f32 %v243_v5, %v233_v2  ;;  %237 = vst [vmem:[#allocation2] sm:$0xf] %v236_v10 }
  0x32   : > { %242 = vst [vmem:[#allocation3] sm:$0xf] %v241_v11 }
  0x33   : > { %245 = vst [vmem:[#allocation4] sm:$0xf] %v244_v9 }
  0x34   : > { %vm257_vm1 = vcmask 1041408   ;;  %vm305_vm6 = vcmask 1024  }
  0x38   : > { %v250_v12 = vld [vmem:[#allocation2] sm:$0xf] }
  0x39   : > { %252 = vst [vmem:[#allocation1] ss:$4 sm:$0xff] %v250_v12  ;;  %v263_v13 = vld [vmem:[#allocation3] sm:$0xf] }
  0x3a   : > { %v275_v19 = vld [vmem:[#allocation4] sm:$0xf] }
  0x40   : > { %v253_v14 = vld.sshfl [vmem:[#allocation1] sm:$0xff pattern:$0x73625140]  ;;  %v254_v15 = vld.sshfl [vmem:[#allocation1 + $0x8] sm:$0xff pattern:$0x73625140] }
  0x41   : > { %265 = vst [vmem:[#allocation1] ss:$4 sm:$0xff] %v263_v13  ;;  %v258_v16 = vsel %vm257_vm1, %v253_v14, 0.0  ;;  %v259_v17 = vsel %vm257_vm1, %v254_v15, 0.0 }
  0x42   : > { %v260_v18 = vadd.f32 %v259_v17, %v258_v16 }
  0x44   : > { %261 = vadd.xlane.f32.xlu1 %v260_v18 }
  0x48   : > { %v266_v20 = vld.sshfl [vmem:[#allocation1] sm:$0xff pattern:$0x73625140]  ;;  %v267_v21 = vld.sshfl [vmem:[#allocation1 + $0x8] sm:$0xff pattern:$0x73625140] }
  0x49   : > { %v270_v22 = vsel %vm257_vm1, %v266_v20, 0.0  ;;  %v271_v23 = vsel %vm257_vm1, %v267_v21, 0.0  ;;  %277 = vst [vmem:[#allocation1] ss:$4 sm:$0xff] %v275_v19 }
  0x4a   : > { %v272_v24 = vadd.f32 %v271_v23, %v270_v22 }
  0x4c   : > { %273 = vadd.xlane.f32.xlu0 %v272_v24 }
  0x50   : > { %v278_v25 = vld.sshfl [vmem:[#allocation1] sm:$0xff pattern:$0x73625140]  ;;  %v279_v26 = vld.sshfl [vmem:[#allocation1 + $0x8] sm:$0xff pattern:$0x73625140] }
  0x51   : > { %v282_v27 = vsel %vm257_vm1, %v278_v25, 0.0  ;;  %v283_v28 = vsel %vm257_vm1, %v279_v26, 0.0 }
  0x52   : > { %v284_v29 = vadd.f32 %v283_v28, %v282_v27 }
  0x54   : > { %285 = vadd.xlane.f32.xlu0 %v284_v29 }
  0xb7   : > { %v262_v38 = vpop.xlane.xlu1 %261 }
  0xb8   : > { %v287_v42 = vmul.f32 2.0, %v262_v38 }
  0xbf   : > { %v274_v30 = vpop.xlane.xlu0 %273 }
  0xc7   : > { %v286_v31 = vpop.xlane.xlu0 %285 }
  0xc8   : > { %v288_v32 = vadd.f32 %v286_v31, %v274_v30 }
  0xca   : > { %v289_v33 = vadd.f32 1e-12, %v288_v32 }
  0xcc   : > { %488 = vrcp.f32 %v289_v33  ;;  %v301_v37 = vand.u32 2147483648, %v289_v33  ;;  %v299_v40 = vand.u32 2147483647, %v289_v33  ;;  %vm295_vm3 = vweird.f32 %v289_v33 }
  0xce   : > { %v302_v43 = vor.u32 1.1754944e-38, %v301_v37  ;;  %vm300_vm5 = vcmp.eq.f32.partialorder %v299_v40, 8.507059e+37 }
  0xd2   : > { %v489_v34 = vpop.eup %488 }
  0xd3   : > { %v291_v35 = vmul.f32 %v489_v34, %v289_v33  ;;  %vm296_vm2 = vweird.f32 %v489_v34 }
  0xd4   : > { %vm297_vm4 = vmor %vm295_vm3, %vm296_vm2 }
  0xd5   : > { %v292_v36 = vsub.f32 1.0, %v291_v35 }
  0xd7   : > { %v293_v39 = vmul.f32 %v489_v34, %v292_v36 }
  0xd9   : > { %v294_v41 = vadd.f32 %v489_v34, %v293_v39 }
  0xdb   : > { %v298_v44 = vsel %vm297_vm4, %v489_v34, %v294_v41 }
  0xdc   : > { %v303_v45 = vsel %vm300_vm5, %v302_v43, %v298_v44 }
  0xdd   : > { %v304_v46 = vmul.f32 %v303_v45, %v287_v42 }
  0xdf   : > { %306 = vst.msk [vmem:[%s726_s2] sm:$0x3] %vm305_vm6, %v304_v46 }
  0xe0 PF: > { %s18_s14 = sadd.s32 1, %s604_s14   ;;  %s729_s9 = smov %s588_s10 }
  0xe1   : > { %p15_p1 = scmp.ge.s32.totalorder %s18_s14, 6   ;;  %s730_s10 = smov %s592_s11 }
  0xe2   : > { %s731_s11 = smov %s672_s21  ;;  %s732_s12 = smov %s600_s13 }
  0xe3   : > { %s733_s13 = smov %s735_s16  ;;  %17 = sbr.rel (!%p15_p1) target bundleno = 6 (0x6), region = 89 }
  0xe8   :  { %326 = vsyncpa [#allocation6], 1 }
  0xe9   :  { %328 = vsyncpa [#allocation6 + $0x1], 1 }
  0xea   :  { %329 = vsyncpa [#allocation8], 1 }
  0xeb   :  { %331 = vsyncpa [#allocation8 + $0x1], 1 }

</bundles_post_ra>
